<compile_context>
chip_gen: v7x
topology: tpu7x:2x2x1
jax: 0.10.0
libtpu: 0.0.40
codegen_flags: <defaults>
</compile_context>

<pallas_src>
import jax
import jax.numpy as jnp
from jax.experimental import pallas as pl
from jax.experimental.pallas import tpu as pltpu

IN_F, H1_F, H2_F, OUT_F = 10, 20, 15, 5


def mlp_kernel(xT_ref, w1_ref, b1_ref, w2_ref, b2_ref, w3_ref, b3_ref, o_ref):
    # xT_ref: (10, Bt) bf16 tile of x^T.  Weights are PyTorch-layout (out, in),
    # biases are (out, 1) columns broadcast along the lane (batch) axis.
    x = xT_ref[...].astype(jnp.float32)                                  # (10, Bt)
    h1 = jnp.dot(w1_ref[...], x, preferred_element_type=jnp.float32)     # (20, Bt)
    h1 = jnp.maximum(h1 + b1_ref[...], 0.0)
    h2 = jnp.dot(w2_ref[...], h1, preferred_element_type=jnp.float32)    # (15, Bt)
    h2 = jnp.maximum(h2 + b2_ref[...], 0.0)
    h3 = jnp.dot(w3_ref[...], h2, preferred_element_type=jnp.float32)    # (5, Bt)
    o_ref[...] = jax.nn.sigmoid(h3 + b3_ref[...]).astype(o_ref.dtype)


def _round_up(n, m):
    return (n + m - 1) // m * m


def simple_nn_forward(x, params, *, block_b=1024, stream_dtype=jnp.bfloat16):
    """x: (B, 10) float32.  params: PyTorch-layout weights/biases.  Returns (B, 5) f32."""
    B = x.shape[0]
    assert x.shape[1] == IN_F

    # Batch tile: multiple of 128 (lane width); shrink for small batches, pad B
    # so it divides evenly into tiles.
    bt = _round_up(min(block_b, _round_up(B, 128)), 128)
    b_pad = _round_up(B, bt)
    n_tiles = b_pad // bt

    # Lane-dense plumbing: batch on the last (lane) axis, streamed as bf16.
    # In a larger pipeline the producer would emit this layout directly.
    xT = jnp.pad(x, ((0, b_pad - B), (0, 0))).T.astype(stream_dtype)     # (10, b_pad)

    w1, w2, w3 = params["w1"], params["w2"], params["w3"]                # (out, in) f32
    b1 = params["b1"].reshape(H1_F, 1).astype(jnp.float32)
    b2 = params["b2"].reshape(H2_F, 1).astype(jnp.float32)
    b3 = params["b3"].reshape(OUT_F, 1).astype(jnp.float32)

    # Constant index_map -> block stays VMEM-resident across the whole grid.
    const = lambda a: pl.BlockSpec(a.shape, lambda i: (0,) * a.ndim)

    bytes_accessed = (
        int(xT.size) * xT.dtype.itemsize                 # stream x^T (bf16)
        + OUT_F * b_pad * 4                              # write out^T (f32)
        + sum(int(a.size) * 4 for a in (w1, b1, w2, b2, w3, b3))
    )
    cost = pl.CostEstimate(
        flops=2 * b_pad * (IN_F * H1_F + H1_F * H2_F + H2_F * OUT_F),
        transcendentals=b_pad * OUT_F,                   # sigmoid
        bytes_accessed=int(bytes_accessed),
    )

    outT = pl.pallas_call(
        mlp_kernel,
        out_shape=jax.ShapeDtypeStruct((OUT_F, b_pad), jnp.float32),
        grid=(n_tiles,),
        in_specs=[
            pl.BlockSpec((IN_F, bt), lambda i: (0, i)),  # x^T streamed along batch
            const(w1), const(b1),
            const(w2), const(b2),
            const(w3), const(b3),
        ],
        out_specs=pl.BlockSpec((OUT_F, bt), lambda i: (0, i)),
        compiler_params=pltpu.CompilerParams(
            dimension_semantics=("parallel",),           # shard batch grid across TCs (v7x)
            vmem_limit_bytes=32 * 1024 * 1024,           # portable, incl. v7x (64 MiB phys)
        ),
        cost_estimate=cost,
    )(xT, w1, b1, w2, b2, w3, b3)

    return outT.T[:B]                                    # (B, 5) f32


def init_params(key):
    """Deterministic init mimicking nn.Linear's U(-1/sqrt(fan_in), 1/sqrt(fan_in)).

    Weights kept in PyTorch layout (out_features, in_features); biases (out_features,).
    """
    dims = [(IN_F, H1_F), (H1_F, H2_F), (H2_F, OUT_F)]
    params = {}
    for idx, (fan_in, fan_out) in enumerate(dims, start=1):
        key, kw, kb = jax.random.split(key, 3)
        bound = 1.0 / (fan_in ** 0.5)
        params[f"w{idx}"] = jax.random.uniform(
            kw, (fan_out, fan_in), jnp.float32, minval=-bound, maxval=bound)
        params[f"b{idx}"] = jax.random.uniform(
            kb, (fan_out,), jnp.float32, minval=-bound, maxval=bound)
    return params


def reference_forward(x, params, stream_dtype=jnp.bfloat16):
    # Apply the same input quantization the kernel uses for its HBM stream.
    xq = x.astype(stream_dtype).astype(jnp.float32)
    h = jnp.maximum(xq @ params["w1"].T + params["b1"], 0.0)
    h = jnp.maximum(h @ params["w2"].T + params["b2"], 0.0)
    return jax.nn.sigmoid(h @ params["w3"].T + params["b3"])


if __name__ == "__main__":
    key = jax.random.PRNGKey(0)
    key, kx = jax.random.split(key)
    params = init_params(key)

    # Small primary check (B=8): single tile, exercises batch padding 8 -> 128.
    B = 8
    x = jax.random.normal(kx, (B, IN_F), dtype=jnp.float32)
    out = jax.block_until_ready(simple_nn_forward(x, params))
    ref = reference_forward(x, params)
    assert out.shape == (B, OUT_F)
    assert jnp.allclose(out, ref, atol=1e-5, rtol=1e-5)

    # Secondary check: ragged batch with a multi-step grid (300 rows, tile 128).
    key, kx2 = jax.random.split(key)
    B2 = 300
    x2 = jax.random.normal(kx2, (B2, IN_F), dtype=jnp.float32)
    out2 = jax.block_until_ready(simple_nn_forward(x2, params, block_b=128))
    ref2 = reference_forward(x2, params)
    assert out2.shape == (B2, OUT_F)
    assert jnp.allclose(out2, ref2, atol=1e-5, rtol=1e-5)

    print("KERNEL_OK")
</pallas_src>

<mosaic_0001>
module attributes {stable_mosaic.version = 11 : i64} {
  func.func @mlp_kernel(%arg0: i32, %arg1: memref<10x128xbf16, #tpu.memory_space<vmem>>, %arg2: memref<20x10xf32, #tpu.memory_space<vmem>>, %arg3: memref<20x1xf32, #tpu.memory_space<vmem>>, %arg4: memref<15x20xf32, #tpu.memory_space<vmem>>, %arg5: memref<15x1xf32, #tpu.memory_space<vmem>>, %arg6: memref<5x15xf32, #tpu.memory_space<vmem>>, %arg7: memref<5x1xf32, #tpu.memory_space<vmem>>, %arg8: memref<5x128xf32, #tpu.memory_space<vmem>>) attributes {dimension_semantics = [#tpu.dimension_semantics<parallel>], iteration_bounds = array<i64: 1>, scalar_prefetch = 0 : i64, scratch_operands = 0 : i64, tpu.core_type = #tpu.core_type<tc>, window_params = [{transform_indices = @transform_0, window_bounds = array<i64: 10, 128>}, {pipeline_mode = #tpu.pipeline_mode<synchronous>, transform_indices = @transform_1, window_bounds = array<i64: 20, 10>}, {pipeline_mode = #tpu.pipeline_mode<synchronous>, transform_indices = @transform_2, window_bounds = array<i64: 20, 1>}, {pipeline_mode = #tpu.pipeline_mode<synchronous>, transform_indices = @transform_3, window_bounds = array<i64: 15, 20>}, {pipeline_mode = #tpu.pipeline_mode<synchronous>, transform_indices = @transform_4, window_bounds = array<i64: 15, 1>}, {pipeline_mode = #tpu.pipeline_mode<synchronous>, transform_indices = @transform_5, window_bounds = array<i64: 5, 15>}, {pipeline_mode = #tpu.pipeline_mode<synchronous>, transform_indices = @transform_6, window_bounds = array<i64: 5, 1>}, {transform_indices = @transform_7, window_bounds = array<i64: 5, 128>}]} {
    %c0 = arith.constant 0 : index
    %c0_0 = arith.constant 0 : index
    %0 = vector.load %arg1[%c0, %c0_0] : memref<10x128xbf16, #tpu.memory_space<vmem>>, vector<10x128xbf16>
    %1 = arith.extf %0 : vector<10x128xbf16> to vector<10x128xf32>
    %c0_1 = arith.constant 0 : index
    %c0_2 = arith.constant 0 : index
    %2 = vector.load %arg2[%c0_1, %c0_2] : memref<20x10xf32, #tpu.memory_space<vmem>>, vector<20x10xf32>
    %cst = arith.constant dense<0.000000e+00> : vector<20x128xf32>
    %3 = tpu.matmul %2, %1, %cst {dimension_numbers = #tpu.dot_dimension_numbers<[1], [0], [0], [1], [0, 0, 1, 1], [], []>} : vector<20x10xf32>, vector<10x128xf32>, vector<20x128xf32> -> vector<20x128xf32>
    %c0_3 = arith.constant 0 : index
    %c0_4 = arith.constant 0 : index
    %4 = vector.load %arg3[%c0_3, %c0_4] : memref<20x1xf32, #tpu.memory_space<vmem>>, vector<20x1xf32>
    %5 = vector.broadcast %4 : vector<20x1xf32> to vector<20x128xf32>
    %6 = arith.addf %3, %5 : vector<20x128xf32>
    %cst_5 = arith.constant 0.000000e+00 : f32
    %7 = vector.broadcast %cst_5 : f32 to vector<20x128xf32>
    %8 = arith.maximumf %6, %7 : vector<20x128xf32>
    %c0_6 = arith.constant 0 : index
    %c0_7 = arith.constant 0 : index
    %9 = vector.load %arg4[%c0_6, %c0_7] : memref<15x20xf32, #tpu.memory_space<vmem>>, vector<15x20xf32>
    %cst_8 = arith.constant dense<0.000000e+00> : vector<15x128xf32>
    %10 = tpu.matmul %9, %8, %cst_8 {dimension_numbers = #tpu.dot_dimension_numbers<[1], [0], [0], [1], [0, 0, 1, 1], [], []>} : vector<15x20xf32>, vector<20x128xf32>, vector<15x128xf32> -> vector<15x128xf32>
    %c0_9 = arith.constant 0 : index
    %c0_10 = arith.constant 0 : index
    %11 = vector.load %arg5[%c0_9, %c0_10] : memref<15x1xf32, #tpu.memory_space<vmem>>, vector<15x1xf32>
    %12 = vector.broadcast %11 : vector<15x1xf32> to vector<15x128xf32>
    %13 = arith.addf %10, %12 : vector<15x128xf32>
    %cst_11 = arith.constant 0.000000e+00 : f32
    %14 = vector.broadcast %cst_11 : f32 to vector<15x128xf32>
    %15 = arith.maximumf %13, %14 : vector<15x128xf32>
    %c0_12 = arith.constant 0 : index
    %c0_13 = arith.constant 0 : index
    %16 = vector.load %arg6[%c0_12, %c0_13] : memref<5x15xf32, #tpu.memory_space<vmem>>, vector<5x15xf32>
    %cst_14 = arith.constant dense<0.000000e+00> : vector<5x128xf32>
    %17 = tpu.matmul %16, %15, %cst_14 {dimension_numbers = #tpu.dot_dimension_numbers<[1], [0], [0], [1], [0, 0, 1, 1], [], []>} : vector<5x15xf32>, vector<15x128xf32>, vector<5x128xf32> -> vector<5x128xf32>
    %c0_15 = arith.constant 0 : index
    %c0_16 = arith.constant 0 : index
    %18 = vector.load %arg7[%c0_15, %c0_16] : memref<5x1xf32, #tpu.memory_space<vmem>>, vector<5x1xf32>
    %19 = vector.broadcast %18 : vector<5x1xf32> to vector<5x128xf32>
    %20 = arith.addf %17, %19 : vector<5x128xf32>
    %21 = arith.negf %20 : vector<5x128xf32>
    %22 = math.exp %21 : vector<5x128xf32>
    %cst_17 = arith.constant 1.000000e+00 : f32
    %23 = vector.broadcast %cst_17 : f32 to vector<5x128xf32>
    %24 = arith.addf %23, %22 : vector<5x128xf32>
    %25 = arith.divf %23, %24 : vector<5x128xf32>
    %c0_18 = arith.constant 0 : index
    %c0_19 = arith.constant 0 : index
    %26 = vector.load %arg8[%c0_18, %c0_19] : memref<5x128xf32, #tpu.memory_space<vmem>>, vector<5x128xf32>
    tpu.vector_store %arg8[%c0_18, %c0_19], %25 {strides = array<i32>} : memref<5x128xf32, #tpu.memory_space<vmem>>, vector<5x128xf32>,
    return
  }
  func.func @transform_0(%arg0: i32) -> (i32, i32) {
    %c0_i32 = arith.constant 0 : i32
    %c0_i32_0 = arith.constant 0 : i32
    return %c0_i32, %arg0 : i32, i32
  }
  func.func @transform_1(%arg0: i32) -> (i32, i32) {
    %c0_i32 = arith.constant 0 : i32
    %c0_i32_0 = arith.constant 0 : i32
    %c0_i32_1 = arith.constant 0 : i32
    return %c0_i32, %c0_i32_0 : i32, i32
  }
  func.func @transform_2(%arg0: i32) -> (i32, i32) {
    %c0_i32 = arith.constant 0 : i32
    %c0_i32_0 = arith.constant 0 : i32
    %c0_i32_1 = arith.constant 0 : i32
    return %c0_i32, %c0_i32_0 : i32, i32
  }
  func.func @transform_3(%arg0: i32) -> (i32, i32) {
    %c0_i32 = arith.constant 0 : i32
    %c0_i32_0 = arith.constant 0 : i32
    %c0_i32_1 = arith.constant 0 : i32
    return %c0_i32, %c0_i32_0 : i32, i32
  }
  func.func @transform_4(%arg0: i32) -> (i32, i32) {
    %c0_i32 = arith.constant 0 : i32
    %c0_i32_0 = arith.constant 0 : i32
    %c0_i32_1 = arith.constant 0 : i32
    return %c0_i32, %c0_i32_0 : i32, i32
  }
  func.func @transform_5(%arg0: i32) -> (i32, i32) {
    %c0_i32 = arith.constant 0 : i32
    %c0_i32_0 = arith.constant 0 : i32
    %c0_i32_1 = arith.constant 0 : i32
    return %c0_i32, %c0_i32_0 : i32, i32
  }
  func.func @transform_6(%arg0: i32) -> (i32, i32) {
    %c0_i32 = arith.constant 0 : i32
    %c0_i32_0 = arith.constant 0 : i32
    %c0_i32_1 = arith.constant 0 : i32
    return %c0_i32, %c0_i32_0 : i32, i32
  }
  func.func @transform_7(%arg0: i32) -> (i32, i32) {
    %c0_i32 = arith.constant 0 : i32
    %c0_i32_0 = arith.constant 0 : i32
    return %c0_i32, %arg0 : i32, i32
  }
}

</mosaic_0001>

<bundles_post_ra>
// kernel: tpu_custom_call.1
= control target key start
LH: loop header
LB: loop body
LE: loop exit
PB: predicated region body
PF: predicated region fallthrough
CT: control target
= control target key end

     0   :  { %vm62_vm0 = vcmask 1041408   ;;  %v459_v0 = vmov 0.0|0.0   ;;  %vm460_vm1 = vmmov 1   ;;  %vm461_vm3 = vmmov 0   ;;  %s567_s0 = inlined_call_operand.vmem [shape: bf16[10,128], index: 0, kind: input, shape index: {}]   ;;  %s568_s1 = inlined_call_operand.vmem [shape: f32[20,10], index: 1, kind: input, shape index: {}]   ;;  %s569_s2 = inlined_call_operand.vmem [shape: f32[20,1], index: 2, kind: input, shape index: {}]   ;;  %s570_s3 = inlined_call_operand.vmem [shape: f32[15,20], index: 3, kind: input, shape index: {}]   ;;  %s571_s4 = inlined_call_operand.vmem [shape: f32[15,1], index: 4, kind: input, shape index: {}]   ;;  %s572_s5 = inlined_call_operand.vmem [shape: f32[5,15], index: 5, kind: input, shape index: {}]   ;;  %s573_s6 = inlined_call_operand.vmem [shape: f32[5,1], index: 6, kind: input, shape index: {}]   ;;  %s574_s7 = inlined_call_operand.hbm [shape: f32[5,128], index: 7, kind: output, shape index: {}]  }
   0x1   :  { %409 = vmatprep.subr.bf16.mxu0 %v459_v0  ;;  %v430_v1 = vld [vmem:[%s567_s0] sm:$0x1f]   ;;  %vm411_vm2 = vmpackc.low %vm62_vm0, %vm460_vm1  ;;  %v462_v2 = vmov 0.0   ;;  %vm52_vm4 = vcmask 80896   ;;  %v463_v4 = vmov 0   ;;  %v35_v7 = vld [vmem:[%s569_s2 + $0x8] sm:$0xff] }
   0x2   :  { %384 = vmatprep.mubr.msk.f32.mxu0 %vm461_vm3, %v462_v2  ;;  %412 = vmatpush3.bf16.msk.msra.mxu0 %vm411_vm2, %v430_v1  ;;  %v31_v3 = vld [vmem:[%s568_s1] sm:$0xff]  ;;  %v36_v6 = vld [vmem:[%s569_s2 + $0x10] sm:$0xf] }
   0x3   :  { %428 = vset.pattern.permute.xlu0 %v463_v4  ;;  %v34_v5 = vld [vmem:[%s569_s2] sm:$0xff]  ;;  %429 = vset.pattern.permute.xlu1 %v463_v4 }
   0x4   :  { %39 = vperm.xlu0 %428, %v34_v5   ;;  %49 = vperm.xlu1 %429, %v36_v6  }
   0x5   :  { %12 = vsyncpa [#allocation3], 0  ;;  %385 = vmatmul.mubr.msk.f32.vlgmr.msra.gmra.mrb[0].mxu0 %vm52_vm4, %v31_v3  ;;  %v151_v8 = vld [vmem:[%s571_s4] sm:$0xff]  ;;  %v32_v9 = vld [vmem:[%s568_s1 + $0x8] sm:$0xff]  ;;  %vm163_vm5 = vcmask 162816   ;;  %vm170_vm6 = vcmask 1043456  }
   0x6   :  { %387 = vmatprep.mubr.msk.f32.mxu0 %vm461_vm3, %v462_v2  ;;  %v152_v10 = vld [vmem:[%s571_s4 + $0x8] sm:$0x7f]  ;;  %v252_v11 = vld [vmem:[%s573_s6] sm:$0x1f]  ;;  %v33_v12 = vld [vmem:[%s568_s1 + $0x10] sm:$0xf] }
   0x7   :  { %v149_v13 = vld [vmem:[%s570_s3] sm:$0xff]  ;;  %v150_v30 = vld [vmem:[%s570_s3 + $0x8] sm:$0x7f]  ;;  %vm262_vm7 = vcmask 1046528   ;;  %vm258_vm9 = vcmask 121856   ;;  %s464_s21 = smov [#allocation2]  }
   0x8   :  { %44 = vperm.xlu0 %428, %v35_v7   ;;  %155 = vperm.xlu1 %429, %v151_v8   ;;  %vm419_vm8 = vmpackc.low %vm262_vm7, %vm460_vm1  ;;  %v251_v40 = vld [vmem:[%s572_s5] sm:$0x1f]  ;;  %s349_s22 = sshll.u32 %s464_s21, 4  ;;  %s350_s22 = int_to_ptr.vmem [resolvable:$true] %s349_s22 }
   0x9   :  { %388 = vmatmul.mubr.msk.f32.gmra.mrb[2].mxu0 %vm52_vm4, %v32_v9  ;;  %399 = vmatprep.mubr.msk.f32.mxu1 %vm163_vm5, %v149_v13  ;;  %s435_s23 = scalar_lea.vmem %s350_s22, 128  ;;  %p440_p1 = scmp.lt.s32.totalorder %s350_s22, %s350_s22 }
   0xa   :  { %390 = vmatprep.mubr.msk.f32.mxu0 %vm461_vm3, %v462_v2  ;;  %p436_p0 = scmp.ne.s32.totalorder %s350_s22, %s435_s23  ;;  %p441_p2 = scmp.lt.s32.totalorder %s435_s23, %s435_s23 }
   0xc   :  { %160 = vperm.xlu0 %428, %v152_v10   ;;  %255 = vperm.xlu1 %429, %v252_v11   ;;  %p442_p3 = por %p441_p2, %p440_p1 }
   0xd   :  { %391 = vmatmul.mubr.msk.f32.gmra.mrb[4].mxu0 %vm52_vm4, %v33_v12 }
   0xe   :  { %p443_p4 = pnand %p442_p3, %p436_p0 }
  0x83   :  { %v40_v14 = vpop.permute.xlu0 %39  ;;  %v50_v24 = vpop.permute.xlu1 %49 }
  0x87   :  { %v45_v18 = vpop.permute.xlu0 %44  ;;  %v156_v33 = vpop.permute.xlu1 %155 }
  0x8b   :  { %v161_v31 = vpop.permute.xlu0 %160  ;;  %v256_v41 = vpop.permute.xlu1 %255 }
  0xd8   :  { %v132_v15 = vpop.f32.mrb[0].mxu0 }
  0xd9   :  { %v386_v16 = vpop.f32.mrb[1].mxu0  ;;  %v133_v17 = vadd.f32 %v132_v15, %v40_v14 }
  0xdb   :  { %v146_v22 = vmax.f32 %v133_v17, 0.0 }
  0xdc   :  { %v137_v19 = vpop.f32.mrb[2].mxu0 }
  0xdd   :  { %v138_v20 = vadd.f32 %v137_v19, %v45_v18  ;;  %v389_v21 = vpop.f32.mrb[3].mxu0 }
  0xdf   :  { %v147_v23 = vmax.f32 %v138_v20, 0.0 }
  0xe0   :  { %v142_v25 = vpop.f32.mrb[4].mxu0 }
  0xe1   :  { %v143_v26 = vadd.f32 %v142_v25, %v50_v24  ;;  %v392_v27 = vpop.f32.mrb[5].mxu0  ;;  %v413_v28 = vpack.c.bf16 %v147_v23, %v146_v22 }
  0xe3   :  { %v148_v29 = vmax.f32 %v143_v26, 0.0  ;;  %414 = vmatprep.subr.bf16.mxu1 %v413_v28 }
  0xe4   :  { %416 = vmatpush3.bf16.msra.mxu1 %v413_v28 }
  0xe5   :  { %397 = vmatprep.subr.msk.mxu1 %vm170_vm6, %v148_v29 }
  0xe8   :  { %398 = vmatpush3.msk.msra.mxu1 %vm170_vm6, %v148_v29 }
  0xe9   :  { %400 = vmatmul.mubr.msk.f32.vlgmr.msra.gmra.mrb[0].mxu1 %vm163_vm5, %v150_v30  ;;  %417 = vmatprep.subr.bf16.mxu1 %v459_v0 }
  0xea   :  { %406 = vmatprep.mubr.msk.f32.mxu1 %vm461_vm3, %v462_v2 }
 0x1bc   :  { %v401_v32 = vpop.f32.mrb[0].mxu1 }
 0x1bd   :  { %v246_v34 = vadd.f32 %v401_v32, %v161_v31  ;;  %v240_v35 = vpop.f32.mrb[1].mxu1 }
 0x1be   :  { %v241_v36 = vadd.f32 %v240_v35, %v156_v33 }
 0x1bf   :  { %v250_v37 = vmax.f32 %v246_v34, 0.0 }
 0x1c0   :  { %v249_v38 = vmax.f32 %v241_v36, 0.0 }
 0x1c2   :  { %v418_v39 = vpack.c.bf16 %v250_v37, %v249_v38 }
 0x1c4   :  { %420 = vmatpush3.bf16.msk.msra.mxu1 %vm419_vm8, %v418_v39 }
 0x1c7   :  { %407 = vmatmul.mubr.msk.f32.vlgmr.msra.gmra.mrb[2].mxu1 %vm258_vm9, %v251_v40 }
 0x29a   :  { %v332_v42 = vpop.f32.mrb[2].mxu1 }
 0x29b   :  { %v333_v43 = vadd.f32 %v332_v42, %v256_v41  ;;  %v408_v44 = vpop.f32.mrb[3].mxu1 }
 0x29d   :  { %v366_v45 = vmul.f32 -1.442695, %v333_v43 }
 0x29f   :  { %431 = vpow2.f32 %v366_v45 }
 0x2a9   :  { %v432_v46 = vpop.eup %431 }
 0x2aa   :  { %v339_v47 = vadd.f32 1.0, %v432_v46 }
 0x2ac   :  { %433 = vrcp.f32 %v339_v47 }
 0x2b6   :  { %v434_v48 = vpop.eup %433 }
 0x2b7   :  { %342 = vst [vmem:[#allocation2] sm:$0x1f] %v434_v48 }
 0x2b8   :  { %446 = shalt.err (!%p443_p4)
}
 0x2b9   :  { %s447_s25 = scalar_lea.hbm %s574_s7, 128 }
 0x2ba   :  { %p448_p5 = scmp.ne.s32.totalorder %s574_s7, %s447_s25  ;;  %p451_p6 = scmp.lt.u32.totalorder %s447_s25, %s574_s7 }
 0x2bc   :  { %p453_p7 = pnand %p451_p6, %p448_p5 }
 0x2be   :  { %456 = shalt.err (!%p453_p7)
}
 0x2bf   :  { %352 = dma.vmem_to_hbm [thread:$0]  %s350_s22, 128, %s574_s7, [#allocation3]  }
 0x2c0   :  { %457 = dma.done.wait [#allocation3], 128  }
 0x2c1   :  { %458 = vsyncadd [#allocation3], 4294967168 }
 0x2c2   :  { %356 = vsyncpa [#allocation3], 1 }

</bundles_post_ra>
